<compile_context>
chip_gen: v5e
topology: v5e:2x2
jax: 0.10.0
libtpu: 0.0.40
codegen_flags: <defaults>
</compile_context>

<pallas_src>
import functools

import jax
import jax.numpy as jnp
from jax.experimental import pallas as pl
from jax.experimental.pallas import tpu as pltpu

_HIDDEN = 256
_LANE = 128
_SUBLANE = 8


def _round_up(x, m):
    return (x + m - 1) // m * m


def _mlp_kernel(x_ref, w1_ref, b1_ref, w2_ref, b2_ref, w3_ref, b3_ref, o_ref):
    # One batch tile [TB, obs_dim] -> [TB, act_pad]. Weights/biases are read once
    # per grid step and stay VMEM-resident across steps (index_map -> (0, 0)).
    x = x_ref[...].astype(jnp.bfloat16)
    h = jnp.dot(x, w1_ref[...], preferred_element_type=jnp.float32) + b1_ref[...]
    h = jnp.maximum(h, 0.0)                                   # activation() == ReLU (f32 epilogue)
    h = jnp.dot(h.astype(jnp.bfloat16), w2_ref[...],
                preferred_element_type=jnp.float32) + b2_ref[...]
    h = jnp.maximum(h, 0.0)                                   # activation() == ReLU
    out = jnp.dot(h.astype(jnp.bfloat16), w3_ref[...],
                  preferred_element_type=jnp.float32) + b3_ref[...]
    # output_activation() == Identity
    o_ref[...] = out.astype(o_ref.dtype)


def policynet_forward(obs, params):
    """Pallas implementation of policynet.forward.

    obs: [B, obs_dim] or [obs_dim] float32
    params: w1[obs_dim,256] bf16, b1[1,256] f32, w2[256,256] bf16, b2[1,256] f32,
            w3[256,act_dim] bf16, b3[1,act_dim] f32
    """
    squeezed_in = obs.ndim == 1
    if squeezed_in:
        obs = obs[None, :]                 # torch: obs.unsqueeze(0)
    obs = obs.astype(jnp.float32)

    B, obs_dim = obs.shape
    hidden = params["w1"].shape[1]
    act_dim = params["w3"].shape[1]

    # Lane-dense output: pad act_dim up to a multiple of 128 with zero columns.
    act_pad = _round_up(max(act_dim, _LANE), _LANE)
    w3, b3 = params["w3"], params["b3"]
    if act_pad != act_dim:
        w3 = jnp.pad(w3, ((0, 0), (0, act_pad - act_dim)))
        b3 = jnp.pad(b3, ((0, 0), (0, act_pad - act_dim)))

    # Batch tiling: sublane-aligned tile, B padded to a multiple of it.
    TB = min(256, _round_up(B, _SUBLANE))
    B_pad = _round_up(B, TB)
    if B_pad != B:
        obs = jnp.pad(obs, ((0, B_pad - B), (0, 0)))

    grid = (B_pad // TB,)

    flops = 2 * B_pad * (obs_dim * hidden + hidden * hidden + hidden * act_pad)
    bytes_accessed = (
        obs.size * obs.dtype.itemsize
        + params["w1"].size * params["w1"].dtype.itemsize
        + params["w2"].size * params["w2"].dtype.itemsize
        + w3.size * w3.dtype.itemsize
        + (params["b1"].size + params["b2"].size + b3.size) * 4
        + B_pad * act_pad * 4
    )

    out = pl.pallas_call(
        _mlp_kernel,
        out_shape=jax.ShapeDtypeStruct((B_pad, act_pad), jnp.float32),
        grid=grid,
        in_specs=[
            pl.BlockSpec((TB, obs_dim), lambda i: (i, 0)),       # obs tile
            pl.BlockSpec((obs_dim, hidden), lambda i: (0, 0)),   # w1 (resident)
            pl.BlockSpec((1, hidden), lambda i: (0, 0)),         # b1
            pl.BlockSpec((hidden, hidden), lambda i: (0, 0)),    # w2
            pl.BlockSpec((1, hidden), lambda i: (0, 0)),         # b2
            pl.BlockSpec((hidden, act_pad), lambda i: (0, 0)),   # w3 (padded)
            pl.BlockSpec((1, act_pad), lambda i: (0, 0)),        # b3 (padded)
        ],
        out_specs=pl.BlockSpec((TB, act_pad), lambda i: (i, 0)),
        compiler_params=pltpu.CompilerParams(
            dimension_semantics=("parallel",),
        ),
        cost_estimate=pl.CostEstimate(
            flops=flops, transcendentals=0, bytes_accessed=bytes_accessed),
    )(
        obs,
        params["w1"], params["b1"],
        params["w2"], params["b2"],
        w3, b3,
    )

    out = out[:B, :act_dim]                # drop batch + lane padding
    if out.shape[0] == 1:                  # torch.squeeze(h, 0)
        out = out[0]
    return out


def init_policynet_params(key, obs_dim, act_dim, hidden=_HIDDEN):
    """Deterministic init mimicking PyTorch nn.Linear default (U(-1/sqrt(fan_in), +)).

    Weights are stored [in, out] (transposed vs torch) and in bf16 for the MXU;
    biases stay f32 for the f32 epilogue.
    """
    ks = jax.random.split(key, 6)

    def linear(kw, kb, fan_in, fan_out):
        bound = 1.0 / jnp.sqrt(jnp.float32(fan_in))
        w = jax.random.uniform(kw, (fan_in, fan_out), jnp.float32, -bound, bound)
        b = jax.random.uniform(kb, (1, fan_out), jnp.float32, -bound, bound)
        return w.astype(jnp.bfloat16), b

    w1, b1 = linear(ks[0], ks[1], obs_dim, hidden)
    w2, b2 = linear(ks[2], ks[3], hidden, hidden)
    w3, b3 = linear(ks[4], ks[5], hidden, act_dim)
    return {"w1": w1, "b1": b1, "w2": w2, "b2": b2, "w3": w3, "b3": b3}


def _reference_forward(obs, params):
    # Pure-JAX reference mirroring the kernel's precision path
    # (bf16 matmul operands, f32 accumulation, f32 bias + ReLU).
    if obs.ndim == 1:
        obs = obs[None, :]

    def layer(x, w, b, relu):
        y = jnp.dot(x.astype(jnp.bfloat16), w.astype(jnp.bfloat16),
                    preferred_element_type=jnp.float32) + b
        return jnp.maximum(y, 0.0) if relu else y

    h = layer(obs.astype(jnp.float32), params["w1"], params["b1"], True)
    h = layer(h, params["w2"], params["b2"], True)
    out = layer(h, params["w3"], params["b3"], False)
    if out.shape[0] == 1:
        out = out[0]
    return out


if __name__ == "__main__":
    key = jax.random.PRNGKey(0)
    k_param, k_obs = jax.random.split(key)

    batch, obs_dim, act_dim = 2, 32, 8
    params = init_policynet_params(k_param, obs_dim, act_dim)
    obs = jax.random.normal(k_obs, (batch, obs_dim), jnp.float32)

    fwd = jax.jit(functools.partial(policynet_forward, params=params))
    out = jax.block_until_ready(fwd(obs))

    ref = _reference_forward(obs, params)
    assert out.shape == (batch, act_dim), out.shape
    assert jnp.allclose(out, ref, atol=2e-3, rtol=2e-3), "mismatch vs reference"

    # Also exercise the 1-D obs path (unsqueeze + squeeze semantics).
    out1 = jax.block_until_ready(policynet_forward(obs[0], params))
    assert out1.shape == (act_dim,), out1.shape
    assert jnp.allclose(out1, _reference_forward(obs[0], params),
                        atol=2e-3, rtol=2e-3)

    print("KERNEL_OK")
</pallas_src>

<mosaic_0001>
module attributes {stable_mosaic.version = 11 : i64} {
  func.func @_mlp_kernel(%arg0: i32, %arg1: memref<8x32xf32, #tpu.memory_space<vmem>>, %arg2: memref<32x256xbf16, #tpu.memory_space<vmem>>, %arg3: memref<1x256xf32, #tpu.memory_space<vmem>>, %arg4: memref<256x256xbf16, #tpu.memory_space<vmem>>, %arg5: memref<1x256xf32, #tpu.memory_space<vmem>>, %arg6: memref<256x128xbf16, #tpu.memory_space<vmem>>, %arg7: memref<1x128xf32, #tpu.memory_space<vmem>>, %arg8: memref<8x128xf32, #tpu.memory_space<vmem>>) attributes {dimension_semantics = [#tpu.dimension_semantics<parallel>], iteration_bounds = array<i64: 1>, scalar_prefetch = 0 : i64, scratch_operands = 0 : i64, tpu.core_type = #tpu.core_type<tc>, window_params = [{transform_indices = @transform_0, window_bounds = array<i64: 8, 32>}, {pipeline_mode = #tpu.pipeline_mode<synchronous>, transform_indices = @transform_1, window_bounds = array<i64: 32, 256>}, {pipeline_mode = #tpu.pipeline_mode<synchronous>, transform_indices = @transform_2, window_bounds = array<i64: 1, 256>}, {pipeline_mode = #tpu.pipeline_mode<synchronous>, transform_indices = @transform_3, window_bounds = array<i64: 256, 256>}, {pipeline_mode = #tpu.pipeline_mode<synchronous>, transform_indices = @transform_4, window_bounds = array<i64: 1, 256>}, {pipeline_mode = #tpu.pipeline_mode<synchronous>, transform_indices = @transform_5, window_bounds = array<i64: 256, 128>}, {pipeline_mode = #tpu.pipeline_mode<synchronous>, transform_indices = @transform_6, window_bounds = array<i64: 1, 128>}, {transform_indices = @transform_7, window_bounds = array<i64: 8, 128>}]} {
    %c0 = arith.constant 0 : index
    %c0_0 = arith.constant 0 : index
    %0 = vector.load %arg1[%c0, %c0_0] : memref<8x32xf32, #tpu.memory_space<vmem>>, vector<8x32xf32>
    %1 = arith.truncf %0 : vector<8x32xf32> to vector<8x32xbf16>
    %c0_1 = arith.constant 0 : index
    %c0_2 = arith.constant 0 : index
    %2 = vector.load %arg2[%c0_1, %c0_2] : memref<32x256xbf16, #tpu.memory_space<vmem>>, vector<32x256xbf16>
    %cst = arith.constant dense<0.000000e+00> : vector<8x256xf32>
    %3 = tpu.matmul %1, %2, %cst {dimension_numbers = #tpu.dot_dimension_numbers<[1], [0], [0], [1], [0, 0, 1, 1], [], []>} : vector<8x32xbf16>, vector<32x256xbf16>, vector<8x256xf32> -> vector<8x256xf32>
    %c0_3 = arith.constant 0 : index
    %c0_4 = arith.constant 0 : index
    %4 = vector.load %arg3[%c0_3, %c0_4] : memref<1x256xf32, #tpu.memory_space<vmem>>, vector<1x256xf32>
    %5 = vector.broadcast %4 : vector<1x256xf32> to vector<8x256xf32>
    %6 = arith.addf %3, %5 : vector<8x256xf32>
    %cst_5 = arith.constant 0.000000e+00 : f32
    %7 = vector.broadcast %cst_5 : f32 to vector<8x256xf32>
    %8 = arith.maximumf %6, %7 : vector<8x256xf32>
    %9 = arith.truncf %8 : vector<8x256xf32> to vector<8x256xbf16>
    %c0_6 = arith.constant 0 : index
    %c0_7 = arith.constant 0 : index
    %10 = vector.load %arg4[%c0_6, %c0_7] : memref<256x256xbf16, #tpu.memory_space<vmem>>, vector<256x256xbf16>
    %cst_8 = arith.constant dense<0.000000e+00> : vector<8x256xf32>
    %11 = tpu.matmul %9, %10, %cst_8 {dimension_numbers = #tpu.dot_dimension_numbers<[1], [0], [0], [1], [0, 0, 1, 1], [], []>} : vector<8x256xbf16>, vector<256x256xbf16>, vector<8x256xf32> -> vector<8x256xf32>
    %c0_9 = arith.constant 0 : index
    %c0_10 = arith.constant 0 : index
    %12 = vector.load %arg5[%c0_9, %c0_10] : memref<1x256xf32, #tpu.memory_space<vmem>>, vector<1x256xf32>
    %13 = vector.broadcast %12 : vector<1x256xf32> to vector<8x256xf32>
    %14 = arith.addf %11, %13 : vector<8x256xf32>
    %cst_11 = arith.constant 0.000000e+00 : f32
    %15 = vector.broadcast %cst_11 : f32 to vector<8x256xf32>
    %16 = arith.maximumf %14, %15 : vector<8x256xf32>
    %17 = arith.truncf %16 : vector<8x256xf32> to vector<8x256xbf16>
    %c0_12 = arith.constant 0 : index
    %c0_13 = arith.constant 0 : index
    %18 = vector.load %arg6[%c0_12, %c0_13] : memref<256x128xbf16, #tpu.memory_space<vmem>>, vector<256x128xbf16>
    %cst_14 = arith.constant dense<0.000000e+00> : vector<8x128xf32>
    %19 = tpu.matmul %17, %18, %cst_14 {dimension_numbers = #tpu.dot_dimension_numbers<[1], [0], [0], [1], [0, 0, 1, 1], [], []>} : vector<8x256xbf16>, vector<256x128xbf16>, vector<8x128xf32> -> vector<8x128xf32>
    %c0_15 = arith.constant 0 : index
    %c0_16 = arith.constant 0 : index
    %20 = vector.load %arg7[%c0_15, %c0_16] : memref<1x128xf32, #tpu.memory_space<vmem>>, vector<1x128xf32>
    %21 = vector.broadcast %20 : vector<1x128xf32> to vector<8x128xf32>
    %22 = arith.addf %19, %21 : vector<8x128xf32>
    %c0_17 = arith.constant 0 : index
    %c0_18 = arith.constant 0 : index
    %23 = vector.load %arg8[%c0_17, %c0_18] : memref<8x128xf32, #tpu.memory_space<vmem>>, vector<8x128xf32>
    tpu.vector_store %arg8[%c0_17, %c0_18], %22 {strides = array<i32>} : memref<8x128xf32, #tpu.memory_space<vmem>>, vector<8x128xf32>,
    return
  }
  func.func @transform_0(%arg0: i32) -> (i32, i32) {
    %c0_i32 = arith.constant 0 : i32
    %c0_i32_0 = arith.constant 0 : i32
    return %arg0, %c0_i32 : i32, i32
  }
  func.func @transform_1(%arg0: i32) -> (i32, i32) {
    %c0_i32 = arith.constant 0 : i32
    %c0_i32_0 = arith.constant 0 : i32
    %c0_i32_1 = arith.constant 0 : i32
    return %c0_i32, %c0_i32_0 : i32, i32
  }
  func.func @transform_2(%arg0: i32) -> (i32, i32) {
    %c0_i32 = arith.constant 0 : i32
    %c0_i32_0 = arith.constant 0 : i32
    %c0_i32_1 = arith.constant 0 : i32
    return %c0_i32, %c0_i32_0 : i32, i32
  }
  func.func @transform_3(%arg0: i32) -> (i32, i32) {
    %c0_i32 = arith.constant 0 : i32
    %c0_i32_0 = arith.constant 0 : i32
    %c0_i32_1 = arith.constant 0 : i32
    return %c0_i32, %c0_i32_0 : i32, i32
  }
  func.func @transform_4(%arg0: i32) -> (i32, i32) {
    %c0_i32 = arith.constant 0 : i32
    %c0_i32_0 = arith.constant 0 : i32
    %c0_i32_1 = arith.constant 0 : i32
    return %c0_i32, %c0_i32_0 : i32, i32
  }
  func.func @transform_5(%arg0: i32) -> (i32, i32) {
    %c0_i32 = arith.constant 0 : i32
    %c0_i32_0 = arith.constant 0 : i32
    %c0_i32_1 = arith.constant 0 : i32
    return %c0_i32, %c0_i32_0 : i32, i32
  }
  func.func @transform_6(%arg0: i32) -> (i32, i32) {
    %c0_i32 = arith.constant 0 : i32
    %c0_i32_0 = arith.constant 0 : i32
    %c0_i32_1 = arith.constant 0 : i32
    return %c0_i32, %c0_i32_0 : i32, i32
  }
  func.func @transform_7(%arg0: i32) -> (i32, i32) {
    %c0_i32 = arith.constant 0 : i32
    %c0_i32_0 = arith.constant 0 : i32
    return %arg0, %c0_i32 : i32, i32
  }
}

</mosaic_0001>

<bundles_post_ra>
// kernel: policynet_forward.1
= control target key start
LH: loop header
LB: loop body
LE: loop exit
PB: predicated region body
PF: predicated region fallthrough
CT: control target
= control target key end

     0   :  { %12 = vsyncpa [#allocation3], 0  ;;  %s978_s0 = inlined_call_operand.vmem [shape: f32[8,32], index: 0, kind: input, shape index: {}]   ;;  %s979_s1 = inlined_call_operand.hbm [shape: bf16[32,256], index: 1, kind: input, shape index: {}]   ;;  %s980_s2 = inlined_call_operand.vmem [shape: f32[1,256], index: 2, kind: input, shape index: {}]   ;;  %s981_s3 = inlined_call_operand.hbm [shape: bf16[256,256], index: 3, kind: input, shape index: {}]   ;;  %s982_s4 = inlined_call_operand.vmem [shape: f32[1,256], index: 4, kind: input, shape index: {}]   ;;  %s983_s5 = inlined_call_operand.hbm [shape: bf16[256,128], index: 5, kind: input, shape index: {}]   ;;  %s984_s6 = inlined_call_operand.vmem [shape: f32[1,128], index: 6, kind: input, shape index: {}]   ;;  %s985_s7 = inlined_call_operand.vmem [shape: f32[8,128], index: 7, kind: output, shape index: {}]  }
   0x1   :  { %13 = vsyncpa [#allocation5], 0  ;;  %s35_s26 = sshll.u32 %s981_s3, 4  ;;  %s905_s27 = smov [#allocation4]   ;;  %s36_s26 = int_to_ptr.hbm [resolvable:$true] %s35_s26 }
   0x2   :  { %s37_s28 = sshll.u32 %s905_s27, 4  ;;  %s20_s8 = sshll.u32 %s979_s1, 4  ;;  %s38_s28 = int_to_ptr.vmem [resolvable:$true] %s37_s28  ;;  %s21_s8 = int_to_ptr.hbm [resolvable:$true] %s20_s8 }
   0x3   :  { %s906_s9 = smov 128   ;;  %s907_s10 = smov 8  }
   0x4   :  { %43 = dma.hbm_to_vmem [thread:$0]  %s36_s26, 4096, %s38_s28, [#allocation5], %s906_s9, %s906_s9, %s907_s10  }
   0x5   :  { %s908_s11 = smov [#allocation2]   ;;  %s50_s15 = sshll.u32 %s983_s5, 4  ;;  %s51_s15 = int_to_ptr.hbm [resolvable:$true] %s50_s15 }
   0x6   :  { %s22_s12 = sshll.u32 %s908_s11, 4  ;;  %s909_s3 = smov [#allocation6]   ;;  %s23_s12 = int_to_ptr.vmem [resolvable:$true] %s22_s12 }
   0x7   :  { %28 = dma.hbm_to_vmem [thread:$0]  %s21_s8, 512, %s23_s12, [#allocation3], %s906_s9, %s906_s9, %s907_s10  }
   0x8   :  { %s52_s16 = sshll.u32 %s909_s3, 4  ;;  %s910_s17 = smov 64   ;;  %s53_s16 = int_to_ptr.vmem [resolvable:$true] %s52_s16 }
   0x9   :  { %s911_s18 = smov 4  }
   0xa   :  { %58 = dma.hbm_to_vmem [thread:$0]  %s51_s15, 2048, %s53_s16, [#allocation5], %s910_s17, %s910_s17, %s911_s18  }
   0xb   :  { %901 = dma.done.wait [#allocation3], 512  }
   0xc   :  { %902 = vsyncadd [#allocation3], 4294966784 }
   0xd   :  { %903 = dma.done.wait [#allocation5], 6144  }
   0xe   :  { %904 = vsyncadd [#allocation5], 4294961152  ;;  %v569_v0 = vld [vmem:[#allocation2 + $0x10] sm:$0xf]  ;;  %v772_v1 = vld [vmem:[#allocation2 + $0x14] sm:$0xf0] }
   0xf   :  { %v771_v2 = vld [vmem:[#allocation2 + $0x14] sm:$0xf]  ;;  %v570_v3 = vor.u32 %v772_v1, %v569_v0  ;;  %v571_v4 = vld [vmem:[#allocation2 + $0x18] sm:$0xf0]  ;;  %v561_v5 = vld [vmem:[#allocation2] sm:$0xf] }
  0x10   :  { %v770_v6 = vld [vmem:[#allocation2 + $0x4] sm:$0xf0]  ;;  %v574_v7 = vor.u32 %v771_v2, %v571_v4  ;;  %v769_v8 = vld [vmem:[#allocation2 + $0x4] sm:$0xf]  ;;  %v563_v9 = vld [vmem:[#allocation2 + $0x8] sm:$0xf0] }
  0x11   :  { %v74_v10 = vld [vmem:[%s978_s0] sm:$0xff]  ;;  %vm106_vm0 = vcmask 261120   ;;  %116 = vmatpush.bf16.msra.mxu0 %v570_v3  ;;  %v562_v11 = vor.u32 %v770_v6, %v561_v5  ;;  %v635_v12 = vld [vmem:[#allocation4 + $0x70] sm:$0xf]  ;;  %v788_v13 = vld [vmem:[#allocation4 + $0x74] sm:$0xf0]  ;;  %v566_v15 = vor.u32 %v769_v8, %v563_v9 }
  0x12   :  { %v699_v14 = vld [vmem:[#allocation4 + $0xf0] sm:$0xf]  ;;  %129 = vmatpush.bf16.msra.mxu1 %v574_v7  ;;  %v636_v16 = vor.u32 %v788_v13, %v635_v12  ;;  %v804_v17 = vld [vmem:[#allocation4 + $0xf4] sm:$0xf0]  ;;  %v787_v18 = vld [vmem:[#allocation4 + $0x74] sm:$0xf]  ;;  %v75_v25 = vpack.c.bf16 %v74_v10, %v74_v10 }
  0x13   :  { %v637_v19 = vld [vmem:[#allocation4 + $0x78] sm:$0xf0]  ;;  %v700_v20 = vor.u32 %v804_v17, %v699_v14  ;;  %v803_v22 = vld [vmem:[#allocation4 + $0xf4] sm:$0xf]  ;;  %v627_v24 = vld [vmem:[#allocation4 + $0x60] sm:$0xf] }
  0x14   :  { %v640_v21 = vor.u32 %v787_v18, %v637_v19  ;;  %v701_v23 = vld [vmem:[#allocation4 + $0xf8] sm:$0xf0]  ;;  %338 = vmatpush.bf16.msra.mxu2 %v636_v16  ;;  %v786_v27 = vld [vmem:[#allocation4 + $0x64] sm:$0xf0]  ;;  %v691_v28 = vld [vmem:[#allocation4 + $0xe0] sm:$0xf] }
  0x15   :  { %v704_v26 = vor.u32 %v803_v22, %v701_v23  ;;  %v802_v29 = vld [vmem:[#allocation4 + $0xe4] sm:$0xf0]  ;;  %117 = vmatpush.bf16.msra.mxu0 %v562_v11  ;;  %351 = vmatpush.bf16.msra.mxu3 %v700_v20  ;;  %v628_v30 = vor.u32 %v786_v27, %v627_v24  ;;  %v785_v32 = vld [vmem:[#allocation4 + $0x64] sm:$0xf]  ;;  %v629_v33 = vld [vmem:[#allocation4 + $0x68] sm:$0xf0] }
  0x16   :  { %v692_v31 = vor.u32 %v802_v29, %v691_v28  ;;  %v801_v34 = vld [vmem:[#allocation4 + $0xe4] sm:$0xf]  ;;  %130 = vmatpush.bf16.msra.mxu1 %v566_v15  ;;  %v632_v35 = vor.u32 %v785_v32, %v629_v33  ;;  %v693_v36 = vld [vmem:[#allocation4 + $0xe8] sm:$0xf0]  ;;  %v619_v37 = vld [vmem:[#allocation4 + $0x50] sm:$0xf] }
  0x17   :  { %v784_v38 = vld [vmem:[#allocation4 + $0x54] sm:$0xf0]  ;;  %v696_v39 = vor.u32 %v801_v34, %v693_v36  ;;  %v683_v40 = vld [vmem:[#allocation4 + $0xd0] sm:$0xf]  ;;  %v783_v42 = vld [vmem:[#allocation4 + $0x54] sm:$0xf] }
  0x18   :  { %v800_v41 = vld [vmem:[#allocation4 + $0xd4] sm:$0xf0]  ;;  %575 = vmatmul.msk.bf16.vlgmr.msra.gmra.mxu0 %vm106_vm0, %v75_v25  ;;  %339 = vmatpush.bf16.msra.mxu2 %v628_v30  ;;  %v620_v43 = vor.u32 %v784_v38, %v619_v37  ;;  %v621_v44 = vld [vmem:[#allocation4 + $0x58] sm:$0xf0]  ;;  %v799_v45 = vld [vmem:[#allocation4 + $0xd4] sm:$0xf] }
  0x19   :  { %364 = vmatpush.bf16.msrb.mxu0 %v640_v21  ;;  %v685_v46 = vld [vmem:[#allocation4 + $0xd8] sm:$0xf0]  ;;  %576 = vmatmul.msk.bf16.vlgmr.msra.gmra.mxu1 %vm106_vm0, %v75_v25  ;;  %v684_v47 = vor.u32 %v800_v41, %v683_v40  ;;  %v611_v48 = vld [vmem:[#allocation4 + $0x40] sm:$0xf]  ;;  %v782_v49 = vld [vmem:[#allocation4 + $0x44] sm:$0xf0]  ;;  %v624_v50 = vor.u32 %v783_v42, %v621_v44 }
  0x1a   :  { %377 = vmatpush.bf16.msrb.mxu1 %v704_v26  ;;  %352 = vmatpush.bf16.msra.mxu3 %v692_v31  ;;  %v675_v51 = vld [vmem:[#allocation4 + $0xc0] sm:$0xf]  ;;  %v798_v52 = vld [vmem:[#allocation4 + $0xc4] sm:$0xf0]  ;;  %v688_v53 = vor.u32 %v799_v45, %v685_v46  ;;  %v781_v54 = vld [vmem:[#allocation4 + $0x44] sm:$0xf]  ;;  %v612_v56 = vor.u32 %v782_v49, %v611_v48 }
  0x1b   :  { %v613_v55 = vld [vmem:[#allocation4 + $0x48] sm:$0xf0]  ;;  %v797_v57 = vld [vmem:[#allocation4 + $0xc4] sm:$0xf]  ;;  %v676_v59 = vor.u32 %v798_v52, %v675_v51  ;;  %v603_v60 = vld [vmem:[#allocation4 + $0x30] sm:$0xf] }
  0x1c   :  { %340 = vmatpush.bf16.msra.mxu2 %v620_v43  ;;  %v677_v58 = vld [vmem:[#allocation4 + $0xc8] sm:$0xf0]  ;;  %v780_v61 = vld [vmem:[#allocation4 + $0x34] sm:$0xf0]  ;;  %v616_v62 = vor.u32 %v781_v54, %v613_v55  ;;  %v667_v63 = vld [vmem:[#allocation4 + $0xb0] sm:$0xf] }
  0x1d   :  { %365 = vmatpush.bf16.msrb.mxu0 %v632_v35  ;;  %v796_v0 = vld [vmem:[#allocation4 + $0xb4] sm:$0xf0]  ;;  %v680_v1 = vor.u32 %v797_v57, %v677_v58  ;;  %v779_v2 = vld [vmem:[#allocation4 + $0x34] sm:$0xf]  ;;  %v605_v3 = vld [vmem:[#allocation4 + $0x38] sm:$0xf0]  ;;  %v604_v4 = vor.u32 %v780_v61, %v603_v60 }
  0x1e   :  { %378 = vmatpush.bf16.msrb.mxu1 %v696_v39  ;;  %353 = vmatpush.bf16.msra.mxu3 %v684_v47  ;;  %v795_v5 = vld [vmem:[#allocation4 + $0xb4] sm:$0xf]  ;;  %v669_v6 = vld [vmem:[#allocation4 + $0xb8] sm:$0xf0]  ;;  %v668_v7 = vor.u32 %v796_v0, %v667_v63  ;;  %v595_v8 = vld [vmem:[#allocation4 + $0x20] sm:$0xf]  ;;  %v608_v10 = vor.u32 %v779_v2, %v605_v3 }
  0x1f   :  { %v778_v9 = vld [vmem:[#allocation4 + $0x24] sm:$0xf0]  ;;  %v659_v11 = vld [vmem:[#allocation4 + $0xa0] sm:$0xf]  ;;  %v672_v13 = vor.u32 %v795_v5, %v669_v6  ;;  %v777_v14 = vld [vmem:[#allocation4 + $0x24] sm:$0xf] }
  0x20   :  { %341 = vmatpush.bf16.msra.mxu2 %v612_v56  ;;  %v794_v12 = vld [vmem:[#allocation4 + $0xa4] sm:$0xf0]  ;;  %v597_v15 = vld [vmem:[#allocation4 + $0x28] sm:$0xf0]  ;;  %v596_v16 = vor.u32 %v778_v9, %v595_v8  ;;  %v793_v17 = vld [vmem:[#allocation4 + $0xa4] sm:$0xf] }
  0x21   :  { %366 = vmatpush.bf16.msrb.mxu0 %v624_v50  ;;  %v661_v18 = vld [vmem:[#allocation4 + $0xa8] sm:$0xf0]  ;;  %v660_v19 = vor.u32 %v794_v12, %v659_v11  ;;  %v600_v20 = vor.u32 %v777_v14, %v597_v15  ;;  %v587_v22 = vld [vmem:[#allocation4 + $0x10] sm:$0xf]  ;;  %v776_v23 = vld [vmem:[#allocation4 + $0x14] sm:$0xf0] }
  0x22   :  { %379 = vmatpush.bf16.msrb.mxu1 %v688_v53  ;;  %354 = vmatpush.bf16.msra.mxu3 %v676_v59  ;;  %v664_v21 = vor.u32 %v793_v17, %v661_v18  ;;  %v651_v24 = vld [vmem:[#allocation4 + $0x90] sm:$0xf]  ;;  %v588_v25 = vor.u32 %v776_v23, %v587_v22  ;;  %v792_v26 = vld [vmem:[#allocation4 + $0x94] sm:$0xf0]  ;;  %v775_v27 = vld [vmem:[#allocation4 + $0x14] sm:$0xf] }
  0x23   :  { %v589_v28 = vld [vmem:[#allocation4 + $0x18] sm:$0xf0]  ;;  %v652_v29 = vor.u32 %v792_v26, %v651_v24  ;;  %v791_v31 = vld [vmem:[#allocation4 + $0x94] sm:$0xf]  ;;  %v579_v34 = vld [vmem:[#allocation4] sm:$0xf] }
  0x24   :  { %342 = vmatpush.bf16.msra.mxu2 %v604_v4  ;;  %v592_v30 = vor.u32 %v775_v27, %v589_v28  ;;  %v653_v32 = vld [vmem:[#allocation4 + $0x98] sm:$0xf0]  ;;  %v774_v35 = vld [vmem:[#allocation4 + $0x4] sm:$0xf0]  ;;  %v643_v36 = vld [vmem:[#allocation4 + $0x80] sm:$0xf] }
  0x25   :  { %367 = vmatpush.bf16.msrb.mxu0 %v616_v62  ;;  %v656_v33 = vor.u32 %v791_v31, %v653_v32  ;;  %v580_v37 = vor.u32 %v774_v35, %v579_v34  ;;  %v790_v38 = vld [vmem:[#allocation4 + $0x84] sm:$0xf0]  ;;  %v773_v39 = vld [vmem:[#allocation4 + $0x4] sm:$0xf]  ;;  %v581_v40 = vld [vmem:[#allocation4 + $0x8] sm:$0xf0] }
  0x26   :  { %380 = vmatpush.bf16.msrb.mxu1 %v680_v1  ;;  %355 = vmatpush.bf16.msra.mxu3 %v668_v7  ;;  %v644_v41 = vor.u32 %v790_v38, %v643_v36  ;;  %v584_v42 = vor.u32 %v773_v39, %v581_v40  ;;  %v789_v43 = vld [vmem:[#allocation4 + $0x84] sm:$0xf]  ;;  %v645_v44 = vld [vmem:[#allocation4 + $0x88] sm:$0xf0]  ;;  %v820_v46 = vld [vmem:[#allocation6 + $0x78] sm:$0xff] }
  0x27   :  { %v648_v45 = vor.u32 %v789_v43, %v645_v44  ;;  %v812_v47 = vld [vmem:[#allocation6 + $0x38] sm:$0xff]  ;;  %v819_v48 = vld [vmem:[#allocation6 + $0x70] sm:$0xff]  ;;  %v818_v50 = vld [vmem:[#allocation6 + $0x68] sm:$0xff] }
  0x28   :  { %343 = vmatpush.bf16.msra.mxu2 %v596_v16  ;;  %v811_v49 = vld [vmem:[#allocation6 + $0x30] sm:$0xff]  ;;  %v810_v51 = vld [vmem:[#allocation6 + $0x28] sm:$0xff]  ;;  %v817_v52 = vld [vmem:[#allocation6 + $0x60] sm:$0xff] }
  0x29   :  { %368 = vmatpush.bf16.msrb.mxu0 %v608_v10  ;;  %v809_v53 = vld [vmem:[#allocation6 + $0x20] sm:$0xff]  ;;  %v816_v54 = vld [vmem:[#allocation6 + $0x58] sm:$0xff]  ;;  %v815_v56 = vld [vmem:[#allocation6 + $0x50] sm:$0xff] }
  0x2a   :  { %381 = vmatpush.bf16.msrb.mxu1 %v672_v13  ;;  %356 = vmatpush.bf16.msra.mxu3 %v660_v19  ;;  %v80_v55 = vld [vmem:[%s980_s2] sm:$0x3]  ;;  %v808_v5 = vld [vmem:[#allocation6 + $0x18] sm:$0xff]  ;;  %v814_v6 = vld [vmem:[#allocation6 + $0x48] sm:$0xff] }
  0x2b   :  { %v82_v57 = vperm.slane %v80_v55, 0  ;;  %v83_v58 = vperm.slane %v80_v55, 1  ;;  %v807_v7 = vld [vmem:[#allocation6 + $0x10] sm:$0xff]  ;;  %v813_v8 = vld [vmem:[#allocation6 + $0x40] sm:$0xff]  ;;  %v806_v9 = vld [vmem:[#allocation6 + $0x8] sm:$0xff] }
  0x2c   :  { %344 = vmatpush.bf16.msra.mxu2 %v588_v25  ;;  %v805_v10 = vld [vmem:[#allocation6] sm:$0xff] }
  0x2d   :  { %369 = vmatpush.bf16.msrb.mxu0 %v600_v20  ;;  %v172_v11 = vld [vmem:[%s982_s4] sm:$0x3] }
  0x2e   :  { %382 = vmatpush.bf16.msrb.mxu1 %v664_v21  ;;  %357 = vmatpush.bf16.msra.mxu3 %v652_v29  ;;  %v175_v12 = vperm.slane %v172_v11, 1  ;;  %v174_v17 = vperm.slane %v172_v11, 0  ;;  %v828_v31 = vld [vmem:[%s984_s6] ss:$0 sm:$0xff] }
  0x30   :  { %345 = vmatpush.bf16.msra.mxu2 %v580_v37 }
  0x31   :  { %370 = vmatpush.bf16.msrb.mxu0 %v592_v30 }
  0x32   :  { %383 = vmatpush.bf16.msrb.mxu1 %v656_v33  ;;  %358 = vmatpush.bf16.msra.mxu3 %v644_v41 }
  0x34   :  { %526 = vmatpush.bf16.msrb.mxu2 %v812_v47 }
  0x35   :  { %371 = vmatpush.bf16.msrb.mxu0 %v584_v42 }
  0x36   :  { %384 = vmatpush.bf16.msrb.mxu1 %v648_v45  ;;  %539 = vmatpush.bf16.msrb.mxu3 %v820_v46 }
  0x38   :  { %527 = vmatpush.bf16.msrb.mxu2 %v811_v49 }
  0x3a   :  { %540 = vmatpush.bf16.msrb.mxu3 %v819_v48 }
  0x3c   :  { %528 = vmatpush.bf16.msrb.mxu2 %v810_v51 }
  0x3e   :  { %541 = vmatpush.bf16.msrb.mxu3 %v818_v50 }
  0x40   :  { %529 = vmatpush.bf16.msrb.mxu2 %v809_v53 }
  0x42   :  { %542 = vmatpush.bf16.msrb.mxu3 %v817_v52 }
  0x44   :  { %530 = vmatpush.bf16.msrb.mxu2 %v808_v5 }
  0x46   :  { %543 = vmatpush.bf16.msrb.mxu3 %v816_v54 }
  0x48   :  { %531 = vmatpush.bf16.msrb.mxu2 %v807_v7 }
  0x4a   :  { %544 = vmatpush.bf16.msrb.mxu3 %v815_v56 }
  0x4c   :  { %532 = vmatpush.bf16.msrb.mxu2 %v806_v9 }
  0x4e   :  { %545 = vmatpush.bf16.msrb.mxu3 %v814_v6 }
  0x50   :  { %533 = vmatpush.bf16.msrb.mxu2 %v805_v10 }
  0x52   :  { %546 = vmatpush.bf16.msrb.mxu3 %v813_v8 }
  0x95   :  { %v119_v59 = vpop.f32.mrf.mxu0 }
  0x96   :  { %v120_v60 = vadd.f32 %v119_v59, %v82_v57  ;;  %v132_v61 = vpop.f32.mrf.mxu1 }
  0x97   :  { %v133_v62 = vadd.f32 %v132_v61, %v83_v58 }
  0x98   :  { %v136_v63 = vmax.f32 %v120_v60, 0.0 }
  0x99   :  { %v137_v0 = vmax.f32 %v133_v62, 0.0 }
  0x9a   :  { %v138_v1 = vpack.c.bf16 %v136_v63, %v136_v63 }
  0x9b   :  { %v139_v2 = vpack.c.bf16 %v137_v0, %v137_v0 }
  0x9c   :  { %346 = vmatmul.bf16.vlgmr.msra.gmra.mxu2 %v138_v1  ;;  %372 = vmatmul.bf16.vlgmr.msrb.gmra.mxu0 %v138_v1 }
  0x9d   :  { %359 = vmatmul.bf16.vlgmr.msra.gmra.mxu3 %v139_v2  ;;  %385 = vmatmul.bf16.vlgmr.msrb.gmra.mxu1 %v139_v2  ;;  %v121_v3 = vpop.f32.mrf.mxu0 }
  0x9e   :  { %v134_v4 = vpop.f32.mrf.mxu1 }
 0x119   :  { %v373_v13 = vpop.f32.mrf.mxu0 }
 0x11a   :  { %v374_v14 = vadd.f32 %v373_v13, %v175_v12  ;;  %v386_v15 = vpop.f32.mrf.mxu1 }
 0x11c   :  { %v387_v16 = vadd.f32 %v386_v15, %v374_v14 }
 0x11e   :  { %v391_v18 = vmax.f32 %v387_v16, 0.0 }
 0x11f   :  { %v347_v19 = vpop.f32.mrf.mxu2 }
 0x120   :  { %v393_v20 = vpack.c.bf16 %v391_v18, %v391_v18  ;;  %v348_v21 = vadd.f32 %v347_v19, %v174_v17  ;;  %v360_v22 = vpop.f32.mrf.mxu3 }
 0x121   :  { %v375_v23 = vpop.f32.mrf.mxu0 }
 0x122   :  { %v361_v24 = vadd.f32 %v360_v22, %v348_v21  ;;  %v388_v25 = vpop.f32.mrf.mxu1  ;;  %547 = vmatmul.bf16.vlgmr.msrb.gmra.mxu3 %v393_v20 }
 0x124   :  { %v390_v26 = vmax.f32 %v361_v24, 0.0 }
 0x126   :  { %v392_v27 = vpack.c.bf16 %v390_v26, %v390_v26 }
 0x127   :  { %v349_v28 = vpop.f32.mrf.mxu2 }
 0x128   :  { %v362_v29 = vpop.f32.mrf.mxu3  ;;  %534 = vmatmul.bf16.vlgmr.msrb.gmra.mxu2 %v392_v27 }
 0x1a5   :  { %v548_v30 = vpop.f32.mrf.mxu3 }
 0x1ab   :  { %v535_v32 = vpop.f32.mrf.mxu2 }
 0x1ac   :  { %v536_v33 = vadd.f32 %v828_v31, %v535_v32 }
 0x1ad   :  { %v550_v34 = vpop.f32.mrf.mxu3 }
 0x1ae   :  { %v549_v35 = vadd.f32 %v548_v30, %v536_v33 }
 0x1b0   :  { %552 = vst [vmem:[%s985_s7] sm:$0xff] %v549_v35 }
 0x1b3   :  { %v537_v36 = vpop.f32.mrf.mxu2 }
 0x1b4   :  { %557 = vsyncpa [#allocation3], 1 }
 0x1b5   :  { %558 = vsyncpa [#allocation5], 1 }

</bundles_post_ra>
